<compile_context>
chip_gen: v6e
topology: v6e:2x2x1
jax: 0.10.0
libtpu: 0.0.40
codegen_flags: <defaults>
</compile_context>

<pallas_src>
import functools

import jax
import jax.numpy as jnp
from jax import lax
from jax.experimental import pallas as pl
from jax.experimental.pallas import tpu as pltpu

_MASK_NUM = 1.0e9     # same value the PyTorch module subtracts on the diagonal
_NEG_BIG = -1.0e30    # running-max init for online logsumexp


def _round_up(x, m):
    return (x + m - 1) // m * m


def _cdiv(a, b):
    return (a + b - 1) // b


def _online_update(m_ref, l_ref, x):
    """One online-logsumexp step on combined [2*blk, 1] state with a [2*blk, blk] tile."""
    blk_max = jnp.max(x, axis=1, keepdims=True)
    m_new = jnp.maximum(m_ref[...], blk_max)
    l_ref[...] = (l_ref[...] * jnp.exp(m_ref[...] - m_new)
                  + jnp.sum(jnp.exp(x - m_new), axis=1, keepdims=True))
    m_ref[...] = m_new


def _align_kernel(rows_ref, tcol_ref, scol_ref, lse_ref, m_ref, l_ref,
                  *, inv_tau, b_real, blk, need_pad):
    """Grid = (row_block i [parallel], col_block j [reduction]).

    rows_ref: [2*blk, D]  pre-normalized, pre-cast [src_i ; tar_i] rows for block i.
    tcol_ref: [blk, D]    tar rows acting as columns (negatives) for block j.
    scol_ref: [blk, D]    src rows acting as columns for block j.
    lse_ref:  [2*blk, 1]  per-row logsumexp output ([lse_a ; lse_b] for block i).
    m_ref/l_ref: [2*blk, 1] f32 online-softmax scratch (combined a/b state).
    """
    i = pl.program_id(0)
    j = pl.program_id(1)

    @pl.when(j == 0)
    def _init():
        m_ref[...] = jnp.full_like(m_ref, _NEG_BIG)
        l_ref[...] = jnp.zeros_like(l_ref)

    rows = rows_ref[...]            # [2*blk, D] (mm dtype)
    tcol = tcol_ref[...]            # [blk, D]
    scol = scol_ref[...]            # [blk, D]

    # contract dim 1 of both operands -> rows @ cols.T without an XLU transpose
    dn = (((1,), (1,)), ((), ()))

    ri = lax.broadcasted_iota(jnp.int32, (2 * blk, blk), 0)
    ci = lax.broadcasted_iota(jnp.int32, (2 * blk, blk), 1)
    on_diag = i == j

    if need_pad:
        pad_add = jnp.where(j * blk + ci >= b_real, -_MASK_NUM, 0.0)

    # ---- product 1: [src ; tar] @ tar_cols.T = [logits_ab ; logits_bb] -----------
    # self-mask hits logits_bb (bottom half) only on the diagonal tile.
    mask_bot = jnp.where(jnp.logical_and(on_diag, ri == ci + blk), -_MASK_NUM, 0.0)
    if need_pad:
        mask_bot = mask_bot + pad_add
    big1 = lax.dot_general(rows, tcol, dn,
                           preferred_element_type=jnp.float32) * inv_tau + mask_bot
    _online_update(m_ref, l_ref, big1)

    # ---- product 2: [src ; tar] @ src_cols.T = [logits_aa ; logits_ba] -----------
    # self-mask hits logits_aa (top half) only on the diagonal tile.
    mask_top = jnp.where(jnp.logical_and(on_diag, ri == ci), -_MASK_NUM, 0.0)
    if need_pad:
        mask_top = mask_top + pad_add
    big2 = lax.dot_general(rows, scol, dn,
                           preferred_element_type=jnp.float32) * inv_tau + mask_top
    _online_update(m_ref, l_ref, big2)

    @pl.when(j == pl.num_programs(1) - 1)
    def _finalize():
        lse_ref[...] = m_ref[...] + jnp.log(l_ref[...])


def entity_modal_align(emb, train_links, weight_norm=None, tau=0.05, alpha=0.5,
                       norm=True, block_b=256, matmul_dtype=jnp.bfloat16):
    """JAX wrapper mirroring EntityModalAlign.forward (the `self.tan` typo read as tau).

    emb:          [num_ent, emb_dim] float
    train_links:  [batch_size, 2] int32 indices into emb
    weight_norm:  optional [num_ent] float per-entity weight table;
                  per-row weight = min(w[src_idx], w[tar_idx]).
    block_b:      row/col tile target (256 good for v5e/v7x, 384-512 for v6e).
    """
    # TODO(synk): the row gather (emb[train_links[:, i]]) stays in XLA; an in-kernel
    # gather would need a per-row pl.Element / manual-DMA scheme incompatible with this tiling.
    src = emb[train_links[:, 0]]
    tar = emb[train_links[:, 1]]
    B, D = src.shape

    # Normalize once in f32 (fuses with the gather in XLA), then cast once to bf16.
    def l2n(x):
        xf = x.astype(jnp.float32)
        if not norm:
            return xf
        ss = jnp.sum(xf * xf, axis=1, keepdims=True)
        # F.normalize(dim=1, eps=1e-12): x / max(||x||, 1e-12) == x * rsqrt(max(||x||^2, 1e-24))
        return xf * lax.rsqrt(jnp.maximum(ss, 1e-24))

    src_f = l2n(src)
    tar_f = l2n(tar)

    # Positive logit (diag of logits_ab == diag of logits_ba), f32, computed once.
    pos = jnp.sum(src_f * tar_f, axis=1) / tau                      # [B]

    if weight_norm is not None:
        w_min = jnp.minimum(weight_norm[train_links[:, 0]],
                            weight_norm[train_links[:, 1]]).astype(jnp.float32)
    else:
        w_min = jnp.ones((B,), jnp.float32)

    src_c = src_f.astype(matmul_dtype)
    tar_c = tar_f.astype(matmul_dtype)

    # Balanced tiles: minimize padded dead rows (< 8 per grid).
    n_blk = _cdiv(B, int(block_b))
    blk = _round_up(_cdiv(B, n_blk), 8)
    b_pad = n_blk * blk
    if b_pad != B:
        pad = b_pad - B
        src_c = jnp.pad(src_c, ((0, pad), (0, 0)))   # zero rows -> finite lse, weight-0 anyway
        tar_c = jnp.pad(tar_c, ((0, pad), (0, 0)))

    # Pre-stacked row operand: block i is [src_i ; tar_i]  (2*blk, D).
    rows = jnp.concatenate(
        [src_c.reshape(n_blk, blk, D), tar_c.reshape(n_blk, blk, D)],
        axis=1).reshape(n_blk * 2 * blk, D)

    kernel = functools.partial(
        _align_kernel, inv_tau=1.0 / float(tau), b_real=int(B), blk=int(blk),
        need_pad=(b_pad != B))

    lse = pl.pallas_call(
        kernel,
        out_shape=jax.ShapeDtypeStruct((n_blk * 2 * blk, 1), jnp.float32),
        grid_spec=pltpu.PrefetchScalarGridSpec(
            num_scalar_prefetch=0,
            grid=(n_blk, n_blk),
            in_specs=[pl.BlockSpec((2 * blk, D), lambda i, j: (i, 0)),   # stacked rows
                      pl.BlockSpec((blk, D), lambda i, j: (j, 0)),       # tar columns
                      pl.BlockSpec((blk, D), lambda i, j: (j, 0))],      # src columns
            out_specs=pl.BlockSpec((2 * blk, 1), lambda i, j: (i, 0)),
            scratch_shapes=[pltpu.VMEM((2 * blk, 1), jnp.float32)] * 2,  # m, l
        ),
        compiler_params=pltpu.CompilerParams(
            dimension_semantics=("parallel", "arbitrary"),
            vmem_limit_bytes=32 * 1024 * 1024,
        ),
    )(rows, tar_c, src_c)

    lse = lse.reshape(n_blk, 2, blk)
    lse_a = lse[:, 0, :].reshape(b_pad)[:B]
    lse_b = lse[:, 1, :].reshape(b_pad)[:B]

    loss = jnp.sum(w_min * (alpha * (lse_a - pos)
                            + (1.0 - alpha) * (lse_b - pos))) / B
    return loss


def _reference(emb, train_links, weight_norm=None, tau=0.05, alpha=0.5, norm=True):
    """Pure-JAX f32 reference mirroring the PyTorch forward (`self.tan` typo read as tau)."""
    if norm:
        emb = emb / jnp.maximum(jnp.linalg.norm(emb, axis=1, keepdims=True), 1e-12)
    src = emb[train_links[:, 0]]
    tar = emb[train_links[:, 1]]
    B = src.shape[0]
    if weight_norm is not None:
        w_min = jnp.minimum(weight_norm[train_links[:, 0]],
                            weight_norm[train_links[:, 1]])
    else:
        w_min = None
    labels = jax.nn.one_hot(jnp.arange(B), 2 * B, dtype=jnp.float32)
    masks = jnp.eye(B, dtype=jnp.float32)
    logits_aa = src @ src.T / tau - masks * _MASK_NUM
    logits_bb = tar @ tar.T / tau - masks * _MASK_NUM
    logits_ab = src @ tar.T / tau
    logits_ba = tar @ src.T / tau
    logits_a = jnp.concatenate([logits_ab, logits_aa], axis=1)
    logits_b = jnp.concatenate([logits_ba, logits_bb], axis=1)

    def soft_xent(labels, logits, w):
        logp = jax.nn.log_softmax(logits, axis=1)
        if w is not None:
            return -(labels * logp * w[:, None]).sum() / logits.shape[0]
        return -(labels * logp).sum() / logits.shape[0]

    return alpha * soft_xent(labels, logits_a, w_min) + \
        (1.0 - alpha) * soft_xent(labels, logits_b, w_min)


if __name__ == "__main__":
    key = jax.random.PRNGKey(0)
    k_emb, k_w, k_emb2, k_w2, k_links2 = jax.random.split(key, 5)

    # --- case 1: small aligned batch (B=8, D=32), single tile -------------------
    num_ent, emb_dim, batch_size = 16, 32, 8
    emb = jax.random.normal(k_emb, (num_ent, emb_dim), dtype=jnp.float32)
    train_links = jnp.stack(
        [jnp.arange(batch_size, dtype=jnp.int32),
         jnp.arange(batch_size, dtype=jnp.int32) + batch_size], axis=1)
    weight_norm = jax.random.uniform(k_w, (num_ent,), dtype=jnp.float32,
                                     minval=0.5, maxval=1.5)

    # f32 matmul path: bit-faithful vs reference
    loss_plain = entity_modal_align(emb, train_links, weight_norm=None,
                                    matmul_dtype=jnp.float32)
    loss_w = entity_modal_align(emb, train_links, weight_norm=weight_norm,
                                matmul_dtype=jnp.float32)
    jax.block_until_ready((loss_plain, loss_w))
    ref_plain = _reference(emb, train_links, weight_norm=None)
    ref_w = _reference(emb, train_links, weight_norm=weight_norm)
    assert jnp.allclose(loss_plain, ref_plain, rtol=1e-4, atol=1e-4), (loss_plain, ref_plain)
    assert jnp.allclose(loss_w, ref_w, rtol=1e-4, atol=1e-4), (loss_w, ref_w)

    # bf16 matmul path (default): relaxed tolerance
    loss_bf16 = entity_modal_align(emb, train_links, weight_norm=weight_norm)
    jax.block_until_ready(loss_bf16)
    assert jnp.allclose(loss_bf16, ref_w, rtol=5e-2, atol=5e-2), (loss_bf16, ref_w)

    # --- case 2: B not a multiple of the tile -> exercises the 2x2 grid,
    #             padded-column masking and padded-row exclusion ----------------
    num_ent2, batch2 = 32, 12
    emb2 = jax.random.normal(k_emb2, (num_ent2, emb_dim), dtype=jnp.float32)
    weight_norm2 = jax.random.uniform(k_w2, (num_ent2,), dtype=jnp.float32,
                                      minval=0.5, maxval=1.5)
    train_links2 = jax.random.randint(k_links2, (batch2, 2), 0, num_ent2,
                                      dtype=jnp.int32)
    loss_tiled = entity_modal_align(emb2, train_links2, weight_norm=weight_norm2,
                                    block_b=8, matmul_dtype=jnp.float32)
    jax.block_until_ready(loss_tiled)
    ref_tiled = _reference(emb2, train_links2, weight_norm=weight_norm2)
    assert jnp.allclose(loss_tiled, ref_tiled, rtol=1e-4, atol=1e-4), (loss_tiled, ref_tiled)

    print("KERNEL_OK")
</pallas_src>

<mosaic_0001>
module attributes {stable_mosaic.version = 11 : i64} {
  func.func @_align_kernel(%arg0: i32, %arg1: i32, %arg2: memref<16x32xf32, #tpu.memory_space<vmem>>, %arg3: memref<8x32xf32, #tpu.memory_space<vmem>>, %arg4: memref<8x32xf32, #tpu.memory_space<vmem>>, %arg5: memref<16x1xf32, #tpu.memory_space<vmem>>, %arg6: memref<16x1xf32, #tpu.memory_space<vmem>>, %arg7: memref<16x1xf32, #tpu.memory_space<vmem>>) attributes {dimension_semantics = [#tpu.dimension_semantics<parallel>, #tpu.dimension_semantics<arbitrary>], iteration_bounds = array<i64: 1, 1>, scalar_prefetch = 0 : i64, scratch_operands = 2 : i64, tpu.core_type = #tpu.core_type<tc>, window_params = [{transform_indices = @transform_0, window_bounds = array<i64: 16, 32>}, {transform_indices = @transform_1, window_bounds = array<i64: 8, 32>}, {transform_indices = @transform_2, window_bounds = array<i64: 8, 32>}, {transform_indices = @transform_3, window_bounds = array<i64: 16, 1>}]} {
    %c0_i32 = arith.constant 0 : i32
    %0 = arith.cmpi eq, %arg1, %c0_i32 : i32
    %1 = arith.extui %0 : i1 to i32
    %c0_i32_0 = arith.constant 0 : i32
    %2 = arith.cmpi ne, %1, %c0_i32_0 : i32
    scf.if %2 {
      %cst_39 = arith.constant -1.000000e+30 : f32
      %68 = vector.broadcast %cst_39 : f32 to vector<16x1xf32>
      %c0_40 = arith.constant 0 : index
      %c0_41 = arith.constant 0 : index
      %69 = vector.load %arg6[%c0_40, %c0_41] : memref<16x1xf32, #tpu.memory_space<vmem>>, vector<16x1xf32>
      tpu.vector_store %arg6[%c0_40, %c0_41], %68 {strides = array<i32>} : memref<16x1xf32, #tpu.memory_space<vmem>>, vector<16x1xf32>,
      %cst_42 = arith.constant 0.000000e+00 : f32
      %70 = vector.broadcast %cst_42 : f32 to vector<16x1xf32>
      %c0_43 = arith.constant 0 : index
      %c0_44 = arith.constant 0 : index
      %71 = vector.load %arg7[%c0_43, %c0_44] : memref<16x1xf32, #tpu.memory_space<vmem>>, vector<16x1xf32>
      tpu.vector_store %arg7[%c0_43, %c0_44], %70 {strides = array<i32>} : memref<16x1xf32, #tpu.memory_space<vmem>>, vector<16x1xf32>,
    } else {
    }
    %c0 = arith.constant 0 : index
    %c0_1 = arith.constant 0 : index
    %3 = vector.load %arg2[%c0, %c0_1] : memref<16x32xf32, #tpu.memory_space<vmem>>, vector<16x32xf32>
    %c0_2 = arith.constant 0 : index
    %c0_3 = arith.constant 0 : index
    %4 = vector.load %arg3[%c0_2, %c0_3] : memref<8x32xf32, #tpu.memory_space<vmem>>, vector<8x32xf32>
    %c0_4 = arith.constant 0 : index
    %c0_5 = arith.constant 0 : index
    %5 = vector.load %arg4[%c0_4, %c0_5] : memref<8x32xf32, #tpu.memory_space<vmem>>, vector<8x32xf32>
    %6 = tpu.iota {dimensions = array<i32: 0>} : vector<16x8xi32>
    %7 = tpu.iota {dimensions = array<i32: 1>} : vector<16x8xi32>
    %8 = arith.cmpi eq, %arg0, %arg1 : i32
    %c8_i32 = arith.constant 8 : i32
    %9 = vector.broadcast %c8_i32 : i32 to vector<16x8xi32>
    %10 = arith.addi %7, %9 : vector<16x8xi32>
    %11 = arith.cmpi eq, %6, %10 : vector<16x8xi32>
    %12 = vector.broadcast %8 : i1 to vector<16x8xi1>
    %13 = arith.andi %12, %11 : vector<16x8xi1>
    %cst = arith.constant -1.000000e+09 : f32
    %cst_6 = arith.constant 0.000000e+00 : f32
    %14 = vector.broadcast %cst : f32 to vector<16x8xf32>
    %15 = vector.broadcast %cst_6 : f32 to vector<16x8xf32>
    %16 = arith.select %13, %14, %15 : vector<16x8xi1>, vector<16x8xf32>
    %cst_7 = arith.constant dense<0.000000e+00> : vector<16x8xf32>
    %17 = tpu.matmul %3, %4, %cst_7 {dimension_numbers = #tpu.dot_dimension_numbers<[1], [1], [0], [0], [0, 0, 1, 0], [], []>} : vector<16x32xf32>, vector<8x32xf32>, vector<16x8xf32> -> vector<16x8xf32>
    %cst_8 = arith.constant 2.000000e+01 : f32
    %18 = vector.broadcast %cst_8 : f32 to vector<16x8xf32>
    %19 = arith.mulf %17, %18 : vector<16x8xf32>
    %20 = arith.addf %19, %16 : vector<16x8xf32>
    %cst_9 = arith.constant dense<0xFF800000> : vector<16xf32>
    %21 = vector.multi_reduction <maximumf>, %20, %cst_9 [1] : vector<16x8xf32> to vector<16xf32>
    %22 = vector.shape_cast %21 : vector<16xf32> to vector<16x1xf32>
    %c0_10 = arith.constant 0 : index
    %c0_11 = arith.constant 0 : index
    %23 = vector.load %arg6[%c0_10, %c0_11] : memref<16x1xf32, #tpu.memory_space<vmem>>, vector<16x1xf32>
    %24 = arith.maximumf %23, %22 : vector<16x1xf32>
    %c0_12 = arith.constant 0 : index
    %c0_13 = arith.constant 0 : index
    %25 = vector.load %arg7[%c0_12, %c0_13] : memref<16x1xf32, #tpu.memory_space<vmem>>, vector<16x1xf32>
    %c0_14 = arith.constant 0 : index
    %c0_15 = arith.constant 0 : index
    %26 = vector.load %arg6[%c0_14, %c0_15] : memref<16x1xf32, #tpu.memory_space<vmem>>, vector<16x1xf32>
    %27 = arith.subf %26, %24 : vector<16x1xf32>
    %28 = math.exp %27 : vector<16x1xf32>
    %29 = arith.mulf %25, %28 : vector<16x1xf32>
    %30 = vector.broadcast %24 : vector<16x1xf32> to vector<16x8xf32>
    %31 = arith.subf %20, %30 : vector<16x8xf32>
    %32 = math.exp %31 : vector<16x8xf32>
    %cst_16 = arith.constant dense<0.000000e+00> : vector<16xf32>
    %33 = vector.multi_reduction <add>, %32, %cst_16 [1] : vector<16x8xf32> to vector<16xf32>
    %34 = vector.shape_cast %33 : vector<16xf32> to vector<16x1xf32>
    %35 = arith.addf %29, %34 : vector<16x1xf32>
    %c0_17 = arith.constant 0 : index
    %c0_18 = arith.constant 0 : index
    %36 = vector.load %arg7[%c0_17, %c0_18] : memref<16x1xf32, #tpu.memory_space<vmem>>, vector<16x1xf32>
    tpu.vector_store %arg7[%c0_17, %c0_18], %35 {strides = array<i32>} : memref<16x1xf32, #tpu.memory_space<vmem>>, vector<16x1xf32>,
    %c0_19 = arith.constant 0 : index
    %c0_20 = arith.constant 0 : index
    %37 = vector.load %arg6[%c0_19, %c0_20] : memref<16x1xf32, #tpu.memory_space<vmem>>, vector<16x1xf32>
    tpu.vector_store %arg6[%c0_19, %c0_20], %24 {strides = array<i32>} : memref<16x1xf32, #tpu.memory_space<vmem>>, vector<16x1xf32>,
    %38 = arith.cmpi eq, %6, %7 : vector<16x8xi32>
    %39 = vector.broadcast %8 : i1 to vector<16x8xi1>
    %40 = arith.andi %39, %38 : vector<16x8xi1>
    %cst_21 = arith.constant -1.000000e+09 : f32
    %cst_22 = arith.constant 0.000000e+00 : f32
    %41 = vector.broadcast %cst_21 : f32 to vector<16x8xf32>
    %42 = vector.broadcast %cst_22 : f32 to vector<16x8xf32>
    %43 = arith.select %40, %41, %42 : vector<16x8xi1>, vector<16x8xf32>
    %cst_23 = arith.constant dense<0.000000e+00> : vector<16x8xf32>
    %44 = tpu.matmul %3, %5, %cst_23 {dimension_numbers = #tpu.dot_dimension_numbers<[1], [1], [0], [0], [0, 0, 1, 0], [], []>} : vector<16x32xf32>, vector<8x32xf32>, vector<16x8xf32> -> vector<16x8xf32>
    %cst_24 = arith.constant 2.000000e+01 : f32
    %45 = vector.broadcast %cst_24 : f32 to vector<16x8xf32>
    %46 = arith.mulf %44, %45 : vector<16x8xf32>
    %47 = arith.addf %46, %43 : vector<16x8xf32>
    %cst_25 = arith.constant dense<0xFF800000> : vector<16xf32>
    %48 = vector.multi_reduction <maximumf>, %47, %cst_25 [1] : vector<16x8xf32> to vector<16xf32>
    %49 = vector.shape_cast %48 : vector<16xf32> to vector<16x1xf32>
    %c0_26 = arith.constant 0 : index
    %c0_27 = arith.constant 0 : index
    %50 = vector.load %arg6[%c0_26, %c0_27] : memref<16x1xf32, #tpu.memory_space<vmem>>, vector<16x1xf32>
    %51 = arith.maximumf %50, %49 : vector<16x1xf32>
    %c0_28 = arith.constant 0 : index
    %c0_29 = arith.constant 0 : index
    %52 = vector.load %arg7[%c0_28, %c0_29] : memref<16x1xf32, #tpu.memory_space<vmem>>, vector<16x1xf32>
    %c0_30 = arith.constant 0 : index
    %c0_31 = arith.constant 0 : index
    %53 = vector.load %arg6[%c0_30, %c0_31] : memref<16x1xf32, #tpu.memory_space<vmem>>, vector<16x1xf32>
    %54 = arith.subf %53, %51 : vector<16x1xf32>
    %55 = math.exp %54 : vector<16x1xf32>
    %56 = arith.mulf %52, %55 : vector<16x1xf32>
    %57 = vector.broadcast %51 : vector<16x1xf32> to vector<16x8xf32>
    %58 = arith.subf %47, %57 : vector<16x8xf32>
    %59 = math.exp %58 : vector<16x8xf32>
    %cst_32 = arith.constant dense<0.000000e+00> : vector<16xf32>
    %60 = vector.multi_reduction <add>, %59, %cst_32 [1] : vector<16x8xf32> to vector<16xf32>
    %61 = vector.shape_cast %60 : vector<16xf32> to vector<16x1xf32>
    %62 = arith.addf %56, %61 : vector<16x1xf32>
    %c0_33 = arith.constant 0 : index
    %c0_34 = arith.constant 0 : index
    %63 = vector.load %arg7[%c0_33, %c0_34] : memref<16x1xf32, #tpu.memory_space<vmem>>, vector<16x1xf32>
    tpu.vector_store %arg7[%c0_33, %c0_34], %62 {strides = array<i32>} : memref<16x1xf32, #tpu.memory_space<vmem>>, vector<16x1xf32>,
    %c0_35 = arith.constant 0 : index
    %c0_36 = arith.constant 0 : index
    %64 = vector.load %arg6[%c0_35, %c0_36] : memref<16x1xf32, #tpu.memory_space<vmem>>, vector<16x1xf32>
    tpu.vector_store %arg6[%c0_35, %c0_36], %51 {strides = array<i32>} : memref<16x1xf32, #tpu.memory_space<vmem>>, vector<16x1xf32>,
    %c0_i32_37 = arith.constant 0 : i32
    %65 = arith.cmpi eq, %arg1, %c0_i32_37 : i32
    %66 = arith.extui %65 : i1 to i32
    %c0_i32_38 = arith.constant 0 : i32
    %67 = arith.cmpi ne, %66, %c0_i32_38 : i32
    scf.if %67 {
      %c0_39 = arith.constant 0 : index
      %c0_40 = arith.constant 0 : index
      %68 = vector.load %arg6[%c0_39, %c0_40] : memref<16x1xf32, #tpu.memory_space<vmem>>, vector<16x1xf32>
      %c0_41 = arith.constant 0 : index
      %c0_42 = arith.constant 0 : index
      %69 = vector.load %arg7[%c0_41, %c0_42] : memref<16x1xf32, #tpu.memory_space<vmem>>, vector<16x1xf32>
      %70 = math.log %69 : vector<16x1xf32>
      %71 = arith.addf %68, %70 : vector<16x1xf32>
      %c0_43 = arith.constant 0 : index
      %c0_44 = arith.constant 0 : index
      %72 = vector.load %arg5[%c0_43, %c0_44] : memref<16x1xf32, #tpu.memory_space<vmem>>, vector<16x1xf32>
      tpu.vector_store %arg5[%c0_43, %c0_44], %71 {strides = array<i32>} : memref<16x1xf32, #tpu.memory_space<vmem>>, vector<16x1xf32>,
    } else {
    }
    return
  }
  func.func @transform_0(%arg0: i32, %arg1: i32) -> (i32, i32) {
    %c0_i32 = arith.constant 0 : i32
    %c0_i32_0 = arith.constant 0 : i32
    return %arg0, %c0_i32 : i32, i32
  }
  func.func @transform_1(%arg0: i32, %arg1: i32) -> (i32, i32) {
    %c0_i32 = arith.constant 0 : i32
    %c0_i32_0 = arith.constant 0 : i32
    return %arg1, %c0_i32 : i32, i32
  }
  func.func @transform_2(%arg0: i32, %arg1: i32) -> (i32, i32) {
    %c0_i32 = arith.constant 0 : i32
    %c0_i32_0 = arith.constant 0 : i32
    return %arg1, %c0_i32 : i32, i32
  }
  func.func @transform_3(%arg0: i32, %arg1: i32) -> (i32, i32) {
    %c0_i32 = arith.constant 0 : i32
    %c0_i32_0 = arith.constant 0 : i32
    return %arg0, %c0_i32 : i32, i32
  }
}

</mosaic_0001>

<bundles_post_ra>
// kernel: tpu_custom_call.1
= control target key start
LH: loop header
LB: loop body
LE: loop exit
PB: predicated region body
PF: predicated region fallthrough
CT: control target
= control target key end

     0   :  { %8 = vsyncpa [#allocation5], 0  ;;  %s557_s0 = inlined_call_operand.hbm [shape: f32[16,32], index: 0, kind: input, shape index: {}]   ;;  %s558_s1 = inlined_call_operand.hbm [shape: f32[8,32], index: 1, kind: input, shape index: {}]   ;;  %s559_s2 = inlined_call_operand.hbm [shape: f32[8,32], index: 2, kind: input, shape index: {}]   ;;  %s560_s3 = inlined_call_operand.vmem [shape: f32[16,1], index: 3, kind: output, shape index: {}]  }
   0x1   :  { %9 = vsyncpa [#allocation7], 0  ;;  %s492_s12 = smov [#allocation6]   ;;  %s493_s14 = smov [#allocation4]  }
   0x2   :  { %s28_s13 = sshll.u32 %s492_s12, 4  ;;  %s15_s15 = sshll.u32 %s493_s14, 4  ;;  %s29_s13 = int_to_ptr.vmem [resolvable:$true] %s28_s13  ;;  %s16_s15 = int_to_ptr.vmem [resolvable:$true] %s15_s15 }
   0x3   :  { %s436_s16 = scalar_lea.vmem %s29_s13, 128  ;;  %p441_p1 = scmp.lt.s32.totalorder %s29_s13, %s29_s13 }
   0x4   :  { %p437_p0 = scmp.ne.s32.totalorder %s29_s13, %s436_s16  ;;  %p442_p2 = scmp.lt.s32.totalorder %s436_s16, %s436_s16 }
   0x6   :  { %p443_p3 = por %p442_p2, %p441_p1 }
   0x8   :  { %p444_p4 = pnand %p443_p3, %p437_p0 }
   0xa   :  { %447 = shalt.err (!%p444_p4)
}
   0xb   :  { %31 = dma.hbm_to_vmem [thread:$0]  %s558_s1, 128, %s29_s13, [#allocation7]  }
   0xc   :  { %s456_s19 = scalar_lea.vmem %s16_s15, 256  ;;  %p461_p6 = scmp.lt.s32.totalorder %s16_s15, %s16_s15 }
   0xd   :  { %p457_p5 = scmp.ne.s32.totalorder %s16_s15, %s456_s19  ;;  %p462_p7 = scmp.lt.s32.totalorder %s456_s19, %s456_s19 }
   0xf   :  { %p463_p8 = por %p462_p7, %p461_p6 }
  0x11   :  { %p464_p9 = pnand %p463_p8, %p457_p5 }
  0x13   :  { %467 = shalt.err (!%p464_p9)
}
  0x14   :  { %s494_s20 = smov 128   ;;  %s495_s21 = smov 8  }
  0x15   :  { %21 = dma.hbm_to_vmem [thread:$0]  %s557_s0, 256, %s16_s15, [#allocation5], %s494_s20, %s494_s20, %s495_s21  }
  0x16   :  { %s496_s24 = smov [#allocation8]  }
  0x17   :  { %s38_s25 = sshll.u32 %s496_s24, 4  ;;  %s39_s25 = int_to_ptr.vmem [resolvable:$true] %s38_s25 }
  0x18   :  { %s476_s26 = scalar_lea.vmem %s39_s25, 128  ;;  %p481_p11 = scmp.lt.s32.totalorder %s39_s25, %s39_s25 }
  0x19   :  { %p477_p10 = scmp.ne.s32.totalorder %s39_s25, %s476_s26  ;;  %p482_p12 = scmp.lt.s32.totalorder %s476_s26, %s476_s26 }
  0x1b   :  { %p483_p13 = por %p482_p12, %p481_p11 }
  0x1d   :  { %p484_p0 = pnand %p483_p13, %p477_p10 }
  0x1f   :  { %487 = shalt.err (!%p484_p0)
}
  0x20   :  { %41 = dma.hbm_to_vmem [thread:$0]  %s559_s2, 128, %s39_s25, [#allocation7]  }
  0x21   :  { %488 = dma.done.wait [#allocation5], 256  }
  0x22   :  { %489 = vsyncadd [#allocation5], 4294967040 }
  0x23   :  { %490 = dma.done.wait [#allocation7], 256  }
  0x24   :  { %491 = vsyncadd [#allocation7], 4294967040  ;;  %vm80_vm0 = vcmask 261120   ;;  %v62_v0 = vld [vmem:[#allocation6] sm:$0xff]  ;;  %v60_v1 = vld [vmem:[#allocation4] sm:$0xff]  ;;  %vm55_vm1 = vcmask 7168   ;;  %v64_v6 = vlaneseq }
  0x25   :  { %388 = vmatprep.subr.msk.mxu0 %vm80_vm0, %v62_v0  ;;  %390 = vmatprep.mubr.msk.f32.mxu0 %vm80_vm0, %v60_v1  ;;  %v63_v2 = vld [vmem:[#allocation8] sm:$0xff]  ;;  %v61_v3 = vld [vmem:[#allocation4 + $0x8] sm:$0xff]  ;;  %v497_v4 = vmov -1e+30   ;;  %v498_v5 = vmov 0.0   ;;  %vm169_vm5 = vcmask 64512  }
  0x26   :  { %389 = vmatpush3.xpose.msk.msra.mxu0 %vm80_vm0, %v62_v0  ;;  %393 = vmatprep.subr.msk.mxu1 %vm80_vm0, %v63_v2  ;;  %56 = vst.msk [vmem:[#allocation2] sm:$0xff] %vm55_vm1, %v497_v4  ;;  %57 = vst.msk [vmem:[#allocation2 + $0x8] sm:$0xff] %vm55_vm1, %v497_v4  ;;  %v65_v7 = vshrl.u32 %v64_v6, 7  ;;  %v68_v8 = vand.u32 127, %v64_v6  ;;  %v499_v29 = vmov 0  }
  0x27   :  { %394 = vmatpush3.xpose.msk.msra.mxu1 %vm80_vm0, %v63_v2  ;;  %395 = vmatprep.mubr.msk.f32.mxu1 %vm80_vm0, %v60_v1  ;;  %58 = vst.msk [vmem:[#allocation3] sm:$0xff] %vm55_vm1, %v498_v5  ;;  %59 = vst.msk [vmem:[#allocation3 + $0x8] sm:$0xff] %vm55_vm1, %v498_v5 }
  0x28   :  { %v66_v9 = vadd.s32 8, %v65_v7  ;;  %v70_v10 = vadd.s32 8, %v68_v8  ;;  %vm219_vm3 = vcmp.eq.s32.totalorder %v65_v7, %v68_v8  ;;  %406 = vset.pattern.permute.xlu0 %v499_v29  ;;  %407 = vset.pattern.permute.xlu1 %v499_v29 }
  0x29   :  { %391 = vmatmul.mubr.msk.f32.vlgmr.msra.gmra.mxu0 %vm80_vm0, %v61_v3  ;;  %v223_v19 = vsel %vm219_vm3, -1e+09, %v498_v5 }
  0x2a   :  { %396 = vmatmul.mubr.msk.f32.vlgmr.msra.gmra.mxu1 %vm80_vm0, %v61_v3  ;;  %vm72_vm2 = vcmp.eq.s32.totalorder %v66_v9, %v70_v10  ;;  %vm220_vm4 = vcmp.eq.s32.totalorder %v66_v9, %v68_v8 }
  0x2b   :  { %v79_v16 = vsel %vm72_vm2, -1e+09, %v498_v5  ;;  %v224_v20 = vsel %vm220_vm4, -1e+09, %v498_v5 }
  0x2d   :  { %v176_v30 = vld [vmem:[#allocation2] sm:$0xff]  ;;  %v177_v33 = vld [vmem:[#allocation2 + $0x8] sm:$0xff] }
  0x2e   :  { %v180_v6 = vld [vmem:[#allocation3] sm:$0xff] }
  0xe9   :  { %v392_v11 = vpop.f32.mrf.mxu0 }
  0xea   :  { %v166_v12 = vmul.f32 20.0, %v392_v11  ;;  %v397_v13 = vpop.f32.mrf.mxu1  ;;  %v181_v11 = vld [vmem:[#allocation3 + $0x8] sm:$0xff] }
  0xeb   :  { %v156_v14 = vpop.f32.mrf.mxu0  ;;  %v304_v15 = vmul.f32 20.0, %v397_v13 }
  0xec   :  { %v165_v17 = vmul.f32 20.0, %v156_v14  ;;  %v294_v18 = vpop.f32.mrf.mxu1  ;;  %v168_v23 = vadd.f32 %v166_v12, %v79_v16 }
  0xed   :  { %v303_v21 = vmul.f32 20.0, %v294_v18  ;;  %v306_v25 = vadd.f32 %v304_v15, %v224_v20 }
  0xee   :  { %v170_v22 = vsel %vm169_vm5, %v165_v17, -inf  ;;  %v173_v27 = vsel %vm169_vm5, %v168_v23, -inf }
  0xef   :  { %171 = vmax.xlane.f32.xlu0 %v170_v22  ;;  %v305_v24 = vadd.f32 %v303_v21, %v223_v19  ;;  %v310_v28 = vsel %vm169_vm5, %v306_v25, -inf }
  0xf1   :  { %v307_v26 = vsel %vm169_vm5, %v305_v24, -inf }
  0xf2   :  { %308 = vmax.xlane.f32.xlu1 %v307_v26 }
  0xf3   :  { %174 = vmax.xlane.f32.xlu0 %v173_v27 }
  0xf6   :  { %311 = vmax.xlane.f32.xlu1 %v310_v28 }
 0x178   :  { %v172_v31 = vpop.xlane.xlu0 %171 }
 0x179   :  { %v178_v32 = vmax.f32 %v176_v30, %v172_v31 }
 0x17b   :  { %v182_v34 = vsub.f32 %v176_v30, %v178_v32  ;;  %217 = vst.msk [vmem:[#allocation2] sm:$0xff] %vm55_vm1, %v178_v32  ;;  %192 = vperm.xlu0 %406, %v178_v32   ;;  %v309_v38 = vpop.xlane.xlu1 %308 }
 0x17c   :  { %v175_v35 = vpop.xlane.xlu0 %174 }
 0x17d   :  { %v179_v36 = vmax.f32 %v177_v33, %v175_v35  ;;  %v184_v2 = vmul.f32 1.442695, %v182_v34 }
 0x17f   :  { %v183_v37 = vsub.f32 %v177_v33, %v179_v36  ;;  %218 = vst.msk [vmem:[#allocation2 + $0x8] sm:$0xff] %vm55_vm1, %v179_v36  ;;  %197 = vperm.xlu1 %407, %v179_v36   ;;  %v312_v42 = vpop.xlane.xlu1 %311 }
 0x181   :  { %v186_v3 = vmul.f32 1.442695, %v183_v37 }
 0x182   :  { %v313_v39 = vld [vmem:[#allocation2] sm:$0xff] }
 0x183   :  { %v315_v40 = vmax.f32 %v313_v39, %v309_v38 }
 0x185   :  { %v319_v41 = vsub.f32 %v313_v39, %v315_v40  ;;  %353 = vst.msk [vmem:[#allocation2] sm:$0xff] %vm55_vm1, %v315_v40  ;;  %329 = vperm.xlu1 %407, %v315_v40  }
 0x186   :  { %v314_v43 = vld [vmem:[#allocation2 + $0x8] sm:$0xff] }
 0x187   :  { %v316_v44 = vmax.f32 %v314_v43, %v312_v42  ;;  %v321_v4 = vmul.f32 1.442695, %v319_v41 }
 0x189   :  { %v320_v45 = vsub.f32 %v314_v43, %v316_v44  ;;  %354 = vst.msk [vmem:[#allocation2 + $0x8] sm:$0xff] %vm55_vm1, %v316_v44  ;;  %334 = vperm.xlu1 %407, %v316_v44  }
 0x18b   :  { %v323_v7 = vmul.f32 1.442695, %v320_v45 }
 0x18c   :  { %v358_v30 = vld [vmem:[#allocation2] sm:$0xff] }
 0x190   :  { %v359_v34 = vld [vmem:[#allocation2 + $0x8] sm:$0xff] }
 0x1f6   :  { %v193_v46 = vpop.permute.xlu0 %192 }
 0x1f7   :  { %v200_v47 = vsub.f32 %v165_v17, %v193_v46 }
 0x1f9   :  { %v202_v48 = vmul.f32 1.442695, %v200_v47 }
 0x1fa   :  { %v198_v49 = vpop.permute.xlu1 %197 }
 0x1fb   :  { %408 = vpow2.f32 %v202_v48  ;;  %v201_v50 = vsub.f32 %v168_v23, %v198_v49 }
 0x1fd   :  { %v204_v51 = vmul.f32 1.442695, %v201_v50 }
 0x1ff   :  { %410 = vpow2.f32 %v204_v51 }
 0x200   :  { %v330_v52 = vpop.permute.xlu1 %329 }
 0x201   :  { %v337_v53 = vsub.f32 %v305_v24, %v330_v52 }
 0x203   :  { %v339_v54 = vmul.f32 1.442695, %v337_v53 }
 0x204   :  { %v335_v55 = vpop.permute.xlu1 %334 }
 0x205   :  { %412 = vpow2.f32 %v339_v54  ;;  %v338_v56 = vsub.f32 %v306_v25, %v335_v55 }
 0x207   :  { %v341_v57 = vmul.f32 1.442695, %v338_v56 }
 0x208   :  { %v409_v58 = vpop.eup %408 }
 0x209   :  { %414 = vpow2.f32 %v341_v57  ;;  %v206_v59 = vsel %vm169_vm5, %v409_v58, 0.0 }
 0x20a   :  { %207 = vadd.xlane.f32.xlu1 %v206_v59  ;;  %416 = vpow2.f32 %v184_v2 }
 0x20b   :  { %418 = vpow2.f32 %v186_v3 }
 0x20c   :  { %v411_v60 = vpop.eup %410  ;;  %420 = vpow2.f32 %v321_v4 }
 0x20d   :  { %v209_v61 = vsel %vm169_vm5, %v411_v60, 0.0  ;;  %422 = vpow2.f32 %v323_v7 }
 0x20e   :  { %210 = vadd.xlane.f32.xlu0 %v209_v61 }
 0x212   :  { %v413_v62 = vpop.eup %412 }
 0x213   :  { %v343_v63 = vsel %vm169_vm5, %v413_v62, 0.0 }
 0x214   :  { %344 = vadd.xlane.f32.xlu1 %v343_v63 }
 0x216   :  { %v415_v0 = vpop.eup %414 }
 0x217   :  { %v346_v1 = vsel %vm169_vm5, %v415_v0, 0.0  ;;  %v417_v5 = vpop.eup %416 }
 0x218   :  { %347 = vadd.xlane.f32.xlu1 %v346_v1  ;;  %v188_v8 = vmul.f32 %v417_v5, %v180_v6  ;;  %v419_v9 = vpop.eup %418 }
 0x219   :  { %v189_v13 = vmul.f32 %v419_v9, %v181_v11  ;;  %v421_v16 = vpop.eup %420 }
 0x21a   :  { %v423_v21 = vpop.eup %422 }
 0x293   :  { %v208_v10 = vpop.xlane.xlu1 %207 }
 0x294   :  { %v212_v12 = vadd.f32 %v208_v10, %v188_v8 }
 0x296   :  { %215 = vst.msk [vmem:[#allocation3] sm:$0xff] %vm55_vm1, %v212_v12 }
 0x297   :  { %v211_v14 = vpop.xlane.xlu0 %210 }
 0x298   :  { %v213_v15 = vadd.f32 %v211_v14, %v189_v13 }
 0x29a   :  { %216 = vst.msk [vmem:[#allocation3 + $0x8] sm:$0xff] %vm55_vm1, %v213_v15 }
 0x29d   :  { %v345_v17 = vpop.xlane.xlu1 %344  ;;  %v317_v18 = vld [vmem:[#allocation3] sm:$0xff] }
 0x29e   :  { %v325_v19 = vmul.f32 %v421_v16, %v317_v18 }
 0x2a0   :  { %v349_v20 = vadd.f32 %v345_v17, %v325_v19 }
 0x2a1   :  { %v318_v22 = vld [vmem:[#allocation3 + $0x8] sm:$0xff]  ;;  %v348_v24 = vpop.xlane.xlu1 %347 }
 0x2a2   :  { %351 = vst.msk [vmem:[#allocation3] sm:$0xff] %vm55_vm1, %v349_v20  ;;  %v326_v23 = vmul.f32 %v423_v21, %v318_v22 }
 0x2a4   :  { %v350_v25 = vadd.f32 %v348_v24, %v326_v23 }
 0x2a6   :  { %352 = vst.msk [vmem:[#allocation3 + $0x8] sm:$0xff] %vm55_vm1, %v350_v25 }
 0x2a9   :  { %v360_v26 = vld [vmem:[#allocation3] sm:$0xff] }
 0x2aa   :  { %424 = vlog2.f32 %v360_v26 }
 0x2ad   :  { %v361_v27 = vld [vmem:[#allocation3 + $0x8] sm:$0xff] }
 0x2ae   :  { %426 = vlog2.f32 %v361_v27 }
 0x2b7   :  { %v425_v28 = vpop.eup %424 }
 0x2b8   :  { %v363_v29 = vmul.f32 0.6931472, %v425_v28 }
 0x2ba   :  { %v366_v31 = vadd.f32 %v363_v29, %v358_v30 }
 0x2bb   :  { %v427_v32 = vpop.eup %426 }
 0x2bc   :  { %368 = vst.msk [vmem:[%s560_s3] sm:$0xff] %vm55_vm1, %v366_v31  ;;  %v365_v33 = vmul.f32 0.6931472, %v427_v32 }
 0x2be   :  { %v367_v35 = vadd.f32 %v365_v33, %v359_v34 }
 0x2c0   :  { %369 = vst.msk [vmem:[%s560_s3 + $0x8] sm:$0xff] %vm55_vm1, %v367_v35 }
 0x2c1   :  { %374 = vsyncpa [#allocation5], 1 }
 0x2c2   :  { %375 = vsyncpa [#allocation7], 1 }

</bundles_post_ra>
